<compile_context>
chip_gen: v6e
topology: v6e:2x2x1
jax: 0.10.0
libtpu: 0.0.40
codegen_flags: <defaults>
</compile_context>

<pallas_src>
import functools
import math

import jax
import jax.numpy as jnp
from jax.experimental import pallas as pl
from jax.experimental.pallas import tpu as pltpu


def _pick_tile(dim: int, want: int, align: int) -> int:
    """Largest tile <= `want` that is a multiple of `align` and divides `dim`;
    falls back to the full dim (always a legal full-extent block)."""
    if dim <= want:
        return dim
    t = (want // align) * align
    while t >= align:
        if dim % t == 0:
            return t
        t -= align
    # TODO(synk): ragged large dims fall back to one full-extent block; a pl.cdiv grid with
    # a masked last tile (pltpu.store + lane mask) would avoid the VMEM blow-up at scale.
    return dim


def _heads_per_block(h: int, d_k: int) -> int:
    """Smallest head group whose width (hb*d_k) is 128-lane dense; falls back to all heads
    (full d_model last-dim block, always legal)."""
    for hb in range(1, h):
        if h % hb == 0 and (hb * d_k) % 128 == 0:
            return hb
    return h


# ---------------------------------------------------------------------------
# Bias-free Linear:  out[M, N] = x[M, K] @ W[N, K]^T
# ---------------------------------------------------------------------------

def _linear_kernel(x_ref, wt_ref, o_ref, acc_ref):
    # x_ref: (tm, tk)   wt_ref: (tk, tn)   o_ref: (tm, tn)   acc_ref: (tm, tn) f32 scratch
    @pl.when(pl.program_id(2) == 0)
    def _init():
        acc_ref[...] = jnp.zeros_like(acc_ref)

    acc_ref[...] += jnp.dot(
        x_ref[...].astype(jnp.bfloat16),
        wt_ref[...].astype(jnp.bfloat16),
        preferred_element_type=jnp.float32,
    )

    @pl.when(pl.program_id(2) == pl.num_programs(2) - 1)
    def _store():
        o_ref[...] = acc_ref[...].astype(o_ref.dtype)


def linear_nobias(x2, weight, *, tm=256, tn=512, tk=1024, vmem_limit_bytes=None):
    """x2: (M, K); weight: (N, K) exactly as nn.Linear.weight; returns (M, N)."""
    M, K = x2.shape
    N = weight.shape[0]
    # One-time transpose to (K, N): the MXU contraction is then in its natural orientation
    # and the resident weight tile is never re-laid-out through the XLU per inner-M step.
    wt = weight.T

    tm_ = _pick_tile(M, tm, 8)      # sublane-aligned activation rows
    tn_ = _pick_tile(N, tn, 128)    # lane-dense output columns
    tk_ = _pick_tile(K, tk, 128)    # contraction tiles -> bounded VMEM on v7x

    itemsize = jnp.dtype(x2.dtype).itemsize
    cost = pl.CostEstimate(
        flops=2 * M * K * N,
        transcendentals=0,
        bytes_accessed=(M * K + N * K + M * N) * itemsize,
    )

    return pl.pallas_call(
        _linear_kernel,
        out_shape=jax.ShapeDtypeStruct((M, N), x2.dtype),
        grid_spec=pltpu.PrefetchScalarGridSpec(
            num_scalar_prefetch=0,
            # Weight axis OUTER, M middle, K innermost: when K fits in one tile the weight
            # block stays resident across the whole inner M loop.
            grid=(N // tn_, M // tm_, K // tk_),
            in_specs=[
                pl.BlockSpec((tm_, tk_), lambda j, i, kk: (i, kk)),   # activations
                pl.BlockSpec((tk_, tn_), lambda j, i, kk: (kk, j)),   # pre-transposed weight
            ],
            out_specs=pl.BlockSpec((tm_, tn_), lambda j, i, kk: (i, j)),
            scratch_shapes=[pltpu.VMEM((tm_, tn_), jnp.float32)],
        ),
        compiler_params=pltpu.CompilerParams(
            dimension_semantics=("parallel", "parallel", "arbitrary"),
            vmem_limit_bytes=vmem_limit_bytes,
        ),
        cost_estimate=cost,
    )(x2, wt)


# ---------------------------------------------------------------------------
# Fused scaled-dot-product attention in merged-head (B, S, d_model) layout.
# Grid: (batch, head-group, query-tile); K/V blocks stay resident across query tiles.
# ---------------------------------------------------------------------------

def _attention_kernel(*refs, d_k, hb, scale, has_mask, return_probs):
    q_ref, k_ref, v_ref = refs[0], refs[1], refs[2]
    n_in = 3 + int(has_mask)
    mask_ref = refs[3] if has_mask else None
    o_ref = refs[n_in]
    attn_ref = refs[n_in + 1] if return_probs else None

    # Pre-scale q (tq*d_k VPU work instead of tq*Sk) and cast MXU operands to bf16.
    q = (q_ref[0].astype(jnp.float32) * scale).astype(jnp.bfloat16)   # (tq, hb*d_k)
    k = k_ref[0].astype(jnp.bfloat16)                                 # (Sk, hb*d_k)
    v = v_ref[0].astype(jnp.bfloat16)                                 # (Sk, hb*d_k)

    if has_mask:
        is_masked = mask_ref[0].astype(jnp.float32) == 0.0            # (1|tq, Sk)

    # NOTE: the reference PyTorch uses masked_fill (not masked_fill_) and discards the
    # result, making its mask a no-op; here we implement the clearly intended masking.
    ctx_parts = []
    for j in range(hb):                                               # static, unrolled
        sl = slice(j * d_k, (j + 1) * d_k)
        scores = jax.lax.dot_general(
            q[:, sl], k[:, sl],
            dimension_numbers=(((1,), (1,)), ((), ())),               # q_h @ k_h^T
            preferred_element_type=jnp.float32,
        )                                                             # (tq, Sk) f32
        if has_mask:
            scores = jnp.where(is_masked, -1e9, scores)
        smax = jnp.max(scores, axis=-1, keepdims=True)
        p = jnp.exp(scores - smax)
        denom = jnp.sum(p, axis=-1, keepdims=True)
        p = p * pl.reciprocal(denom, approx=True)                     # EUP, not VALU divide
        if return_probs:
            attn_ref[0, j] = p.astype(attn_ref.dtype)
        ctx_parts.append(
            jnp.dot(p.astype(jnp.bfloat16), v[:, sl],
                    preferred_element_type=jnp.float32))              # (tq, d_k)
    # Single lane-dense store of the whole head group, already in merged-head layout.
    o_ref[0] = jnp.concatenate(ctx_parts, axis=-1).astype(o_ref.dtype)
    # TODO(synk): attention-prob dropout omitted (inference identity; the original module
    # stores a float for self.dropout, so calling it there would not be valid anyway).
    # TODO(synk): for very long Sk, switch to an Sk-tiled online-softmax (flash) variant so
    # VMEM is O(tq*tk) instead of O(tq*Sk) and K/V stream instead of being fully resident.


def scaled_dot_product_attention(q, k, v, mask3, num_heads, *, return_probs=False,
                                 tq=128, vmem_limit_bytes=None):
    """q: (B, Sq, d_model); k/v: (B, Sk, d_model) in merged-head layout;
    mask3: (B, 1|Sq, Sk) int8 or None.
    Returns ctx (B, Sq, d_model) and, if requested, probs (B, H, Sq, Sk) f32."""
    B, Sq, d_model = q.shape
    Sk = k.shape[1]
    d_k = d_model // num_heads
    scale = 1.0 / math.sqrt(d_k)

    hb = _heads_per_block(num_heads, d_k)     # heads per grid step (128-lane dense width)
    nhb = num_heads // hb
    tq_ = _pick_tile(Sq, tq, 8)
    has_mask = mask3 is not None

    in_specs = [
        pl.BlockSpec((1, tq_, hb * d_k), lambda b, hi, qi: (b, qi, hi)),
        pl.BlockSpec((1, Sk, hb * d_k), lambda b, hi, qi: (b, 0, hi)),   # resident over qi
        pl.BlockSpec((1, Sk, hb * d_k), lambda b, hi, qi: (b, 0, hi)),   # resident over qi
    ]
    operands = [q, k, v]
    if has_mask:
        if mask3.shape[1] == 1:   # key-padding mask: one (1,1,Sk) int8 block per batch
            in_specs.append(pl.BlockSpec((1, 1, Sk), lambda b, hi, qi: (b, 0, 0)))
        else:                     # per-query mask
            in_specs.append(pl.BlockSpec((1, tq_, Sk), lambda b, hi, qi: (b, qi, 0)))
        operands.append(mask3)

    ctx_spec = pl.BlockSpec((1, tq_, hb * d_k), lambda b, hi, qi: (b, qi, hi))
    ctx_shape = jax.ShapeDtypeStruct((B, Sq, d_model), q.dtype)
    if return_probs:
        out_shape = (ctx_shape, jax.ShapeDtypeStruct((B, num_heads, Sq, Sk), jnp.float32))
        out_specs = [ctx_spec,
                     pl.BlockSpec((1, hb, tq_, Sk), lambda b, hi, qi: (b, hi, qi, 0))]
    else:
        out_shape = ctx_shape
        out_specs = ctx_spec

    itemsize = jnp.dtype(q.dtype).itemsize
    bytes_accessed = (q.size + k.size + v.size + q.size) * itemsize
    if has_mask:
        bytes_accessed += mask3.size
    if return_probs:
        bytes_accessed += B * num_heads * Sq * Sk * 4
    cost = pl.CostEstimate(
        flops=4 * B * num_heads * Sq * Sk * d_k,
        transcendentals=B * num_heads * Sq * Sk,
        bytes_accessed=bytes_accessed,
    )

    kernel = functools.partial(_attention_kernel, d_k=d_k, hb=hb, scale=scale,
                               has_mask=has_mask, return_probs=return_probs)

    return pl.pallas_call(
        kernel,
        out_shape=out_shape,
        grid_spec=pltpu.PrefetchScalarGridSpec(
            num_scalar_prefetch=0,
            grid=(B, nhb, Sq // tq_),        # query tiles innermost -> K/V stay resident
            in_specs=in_specs,
            out_specs=out_specs,
        ),
        compiler_params=pltpu.CompilerParams(
            dimension_semantics=("parallel", "parallel", "arbitrary"),
            vmem_limit_bytes=vmem_limit_bytes,
        ),
        cost_estimate=cost,
    )(*operands)


# ---------------------------------------------------------------------------
# Full MultiHeadAttentionBlock forward
# ---------------------------------------------------------------------------

def multi_head_attention_block(q, k, v, mask, w_q, w_k, w_v, w_o, h,
                               return_attn_probs=False):
    """q/k/v: (B, S, d_model); w_*: (d_model, d_model) in nn.Linear layout;
    mask: None or (B,1,{1|Sq},Sk)-broadcastable. Returns out [(B,Sq,d_model)]
    and optionally the attention probabilities (B,h,Sq,Sk)."""
    B, Sq, d_model = q.shape
    Sk = k.shape[1]
    assert d_model % h == 0, "d_model is not divisible by h"

    # ---- Q/K/V projections (single fused weight pass when self-attention) --------------
    if (q is k) and (k is v):
        w_qkv = jnp.concatenate([w_q, w_k, w_v], axis=0)              # (3*d_model, d_model)
        proj = linear_nobias(q.reshape(B * Sq, d_model), w_qkv)        # (B*Sq, 3*d_model)
        qp, kp, vp = jnp.split(proj, 3, axis=-1)
        qp = qp.reshape(B, Sq, d_model)
        kp = kp.reshape(B, Sk, d_model)
        vp = vp.reshape(B, Sk, d_model)
    else:
        qp = linear_nobias(q.reshape(B * Sq, d_model), w_q).reshape(B, Sq, d_model)
        kp = linear_nobias(k.reshape(B * Sk, d_model), w_k).reshape(B, Sk, d_model)
        vp = linear_nobias(v.reshape(B * Sk, d_model), w_v).reshape(B, Sk, d_model)

    # ---- compact mask: (B, 1|Sq, Sk) int8; no (B,1,Sq,Sk) f32 broadcast in HBM ----------
    if mask is None:
        mask3 = None
    else:
        m = mask
        if m.ndim == 4:
            m = m[:, 0]                      # drop the size-1 head dim
        mq = m.shape[-2]
        assert mq in (1, Sq), f"unsupported mask query dim {mq}"
        mask3 = jnp.broadcast_to(m, (B, mq, Sk)).astype(jnp.int8)

    # ---- attention in merged-head layout (no split/merge transposes) --------------------
    attn_out = scaled_dot_product_attention(qp, kp, vp, mask3, h,
                                            return_probs=return_attn_probs)
    if return_attn_probs:
        ctx, probs = attn_out
    else:
        ctx, probs = attn_out, None

    out = linear_nobias(ctx.reshape(B * Sq, d_model), w_o).reshape(B, Sq, d_model)
    if return_attn_probs:
        return out, probs
    return out


# ---------------------------------------------------------------------------
# Reference (plain JAX, highest matmul precision) + test
# ---------------------------------------------------------------------------

def _reference_mha(q, k, v, mask, w_q, w_k, w_v, w_o, h):
    B, Sq, d_model = q.shape
    Sk = k.shape[1]
    d_k = d_model // h
    hp = jax.lax.Precision.HIGHEST

    def lin(x, w):
        return jnp.einsum("bsd,nd->bsn", x, w, precision=hp)

    query = lin(q, w_q).reshape(B, Sq, h, d_k).transpose(0, 2, 1, 3)
    key_p = lin(k, w_k).reshape(B, Sk, h, d_k).transpose(0, 2, 1, 3)
    value = lin(v, w_v).reshape(B, Sk, h, d_k).transpose(0, 2, 1, 3)

    scores = jnp.einsum("bhqd,bhkd->bhqk", query, key_p, precision=hp) / math.sqrt(d_k)
    if mask is not None:
        scores = jnp.where(mask == 0, -1e9, scores)
    probs = jax.nn.softmax(scores, axis=-1)
    ctx = jnp.einsum("bhqk,bhkd->bhqd", probs, value, precision=hp)
    ctx = ctx.transpose(0, 2, 1, 3).reshape(B, Sq, d_model)
    return lin(ctx, w_o), probs


if __name__ == "__main__":
    batch, seq, d_model, h = 2, 8, 32, 4

    key0 = jax.random.PRNGKey(0)
    kq, kk_, kv_, kx, kwq, kwk, kwv, kwo = jax.random.split(key0, 8)

    bound = 1.0 / math.sqrt(d_model)   # nn.Linear default init range
    w_q = jax.random.uniform(kwq, (d_model, d_model), jnp.float32, -bound, bound)
    w_k = jax.random.uniform(kwk, (d_model, d_model), jnp.float32, -bound, bound)
    w_v = jax.random.uniform(kwv, (d_model, d_model), jnp.float32, -bound, bound)
    w_o = jax.random.uniform(kwo, (d_model, d_model), jnp.float32, -bound, bound)

    q = jax.random.normal(kq, (batch, seq, d_model), jnp.float32)
    k = jax.random.normal(kk_, (batch, seq, d_model), jnp.float32)
    v = jax.random.normal(kv_, (batch, seq, d_model), jnp.float32)
    x = jax.random.normal(kx, (batch, seq, d_model), jnp.float32)

    # Padding-style mask: second batch element has its last two key positions masked out.
    mask = jnp.ones((batch, 1, 1, seq), jnp.float32)
    mask = mask.at[1, 0, 0, 6:].set(0.0)

    # Case 1: distinct q/k/v with a key-padding mask, attention probs requested.
    out, attn = multi_head_attention_block(q, k, v, mask, w_q, w_k, w_v, w_o, h,
                                           return_attn_probs=True)
    out = jax.block_until_ready(out)
    attn = jax.block_until_ready(attn)
    ref_out, ref_attn = _reference_mha(q, k, v, mask, w_q, w_k, w_v, w_o, h)
    assert out.shape == (batch, seq, d_model)
    assert attn.shape == (batch, h, seq, seq)
    # Tolerance budget: kernel matmuls use bf16 operands with f32 accumulation, while the
    # reference runs at HIGHEST precision; 2e-2 covers the worst case across v5e/v6e/v7x
    # while still catching structural errors (outputs are O(0.3-1)).
    assert jnp.allclose(out, ref_out, atol=2e-2, rtol=2e-2), \
        float(jnp.max(jnp.abs(out - ref_out)))
    assert jnp.allclose(attn, ref_attn, atol=2e-2, rtol=2e-2), \
        float(jnp.max(jnp.abs(attn - ref_attn)))

    # Case 2: self-attention (same tensor), no mask, no probs
    # -> exercises the fused-QKV projection and the no-mask / no-probs kernel variant.
    out2 = multi_head_attention_block(x, x, x, None, w_q, w_k, w_v, w_o, h)
    out2 = jax.block_until_ready(out2)
    ref_out2, _ = _reference_mha(x, x, x, None, w_q, w_k, w_v, w_o, h)
    assert out2.shape == (batch, seq, d_model)
    assert jnp.allclose(out2, ref_out2, atol=2e-2, rtol=2e-2), \
        float(jnp.max(jnp.abs(out2 - ref_out2)))

    print("KERNEL_OK")
</pallas_src>

<mosaic_0001>
module attributes {stable_mosaic.version = 11 : i64} {
  func.func @_linear_kernel(%arg0: i32, %arg1: i32, %arg2: i32, %arg3: memref<16x32xf32, #tpu.memory_space<vmem>>, %arg4: memref<32x32xf32, #tpu.memory_space<vmem>>, %arg5: memref<16x32xf32, #tpu.memory_space<vmem>>, %arg6: memref<16x32xf32, #tpu.memory_space<vmem>>) attributes {dimension_semantics = [#tpu.dimension_semantics<parallel>, #tpu.dimension_semantics<parallel>, #tpu.dimension_semantics<arbitrary>], iteration_bounds = array<i64: 1, 1, 1>, scalar_prefetch = 0 : i64, scratch_operands = 1 : i64, tpu.core_type = #tpu.core_type<tc>, window_params = [{transform_indices = @transform_0, window_bounds = array<i64: 16, 32>}, {transform_indices = @transform_1, window_bounds = array<i64: 32, 32>}, {transform_indices = @transform_2, window_bounds = array<i64: 16, 32>}]} {
    %c0_i32 = arith.constant 0 : i32
    %0 = arith.cmpi eq, %arg2, %c0_i32 : i32
    %1 = arith.extui %0 : i1 to i32
    %c0_i32_0 = arith.constant 0 : i32
    %2 = arith.cmpi ne, %1, %c0_i32_0 : i32
    scf.if %2 {
      %cst_10 = arith.constant 0.000000e+00 : f32
      %14 = vector.broadcast %cst_10 : f32 to vector<16x32xf32>
      %c0_11 = arith.constant 0 : index
      %c0_12 = arith.constant 0 : index
      %15 = vector.load %arg6[%c0_11, %c0_12] : memref<16x32xf32, #tpu.memory_space<vmem>>, vector<16x32xf32>
      tpu.vector_store %arg6[%c0_11, %c0_12], %14 {strides = array<i32>} : memref<16x32xf32, #tpu.memory_space<vmem>>, vector<16x32xf32>,
    } else {
    }
    %c0 = arith.constant 0 : index
    %c0_1 = arith.constant 0 : index
    %3 = vector.load %arg6[%c0, %c0_1] : memref<16x32xf32, #tpu.memory_space<vmem>>, vector<16x32xf32>
    %c0_2 = arith.constant 0 : index
    %c0_3 = arith.constant 0 : index
    %4 = vector.load %arg3[%c0_2, %c0_3] : memref<16x32xf32, #tpu.memory_space<vmem>>, vector<16x32xf32>
    %5 = arith.truncf %4 : vector<16x32xf32> to vector<16x32xbf16>
    %c0_4 = arith.constant 0 : index
    %c0_5 = arith.constant 0 : index
    %6 = vector.load %arg4[%c0_4, %c0_5] : memref<32x32xf32, #tpu.memory_space<vmem>>, vector<32x32xf32>
    %7 = arith.truncf %6 : vector<32x32xf32> to vector<32x32xbf16>
    %cst = arith.constant dense<0.000000e+00> : vector<16x32xf32>
    %8 = tpu.matmul %5, %7, %cst {dimension_numbers = #tpu.dot_dimension_numbers<[1], [0], [0], [1], [0, 0, 1, 1], [], []>} : vector<16x32xbf16>, vector<32x32xbf16>, vector<16x32xf32> -> vector<16x32xf32>
    %9 = arith.addf %3, %8 : vector<16x32xf32>
    %c0_6 = arith.constant 0 : index
    %c0_7 = arith.constant 0 : index
    %10 = vector.load %arg6[%c0_6, %c0_7] : memref<16x32xf32, #tpu.memory_space<vmem>>, vector<16x32xf32>
    tpu.vector_store %arg6[%c0_6, %c0_7], %9 {strides = array<i32>} : memref<16x32xf32, #tpu.memory_space<vmem>>, vector<16x32xf32>,
    %c0_i32_8 = arith.constant 0 : i32
    %11 = arith.cmpi eq, %arg2, %c0_i32_8 : i32
    %12 = arith.extui %11 : i1 to i32
    %c0_i32_9 = arith.constant 0 : i32
    %13 = arith.cmpi ne, %12, %c0_i32_9 : i32
    scf.if %13 {
      %c0_10 = arith.constant 0 : index
      %c0_11 = arith.constant 0 : index
      %14 = vector.load %arg6[%c0_10, %c0_11] : memref<16x32xf32, #tpu.memory_space<vmem>>, vector<16x32xf32>
      %c0_12 = arith.constant 0 : index
      %c0_13 = arith.constant 0 : index
      %15 = vector.load %arg5[%c0_12, %c0_13] : memref<16x32xf32, #tpu.memory_space<vmem>>, vector<16x32xf32>
      tpu.vector_store %arg5[%c0_12, %c0_13], %14 {strides = array<i32>} : memref<16x32xf32, #tpu.memory_space<vmem>>, vector<16x32xf32>,
    } else {
    }
    return
  }
  func.func @transform_0(%arg0: i32, %arg1: i32, %arg2: i32) -> (i32, i32) {
    %c0_i32 = arith.constant 0 : i32
    return %arg1, %arg2 : i32, i32
  }
  func.func @transform_1(%arg0: i32, %arg1: i32, %arg2: i32) -> (i32, i32) {
    %c0_i32 = arith.constant 0 : i32
    return %arg2, %arg0 : i32, i32
  }
  func.func @transform_2(%arg0: i32, %arg1: i32, %arg2: i32) -> (i32, i32) {
    %c0_i32 = arith.constant 0 : i32
    return %arg1, %arg0 : i32, i32
  }
}

</mosaic_0001>

<bundles_post_ra>
// kernel: tpu_custom_call.1
= control target key start
LH: loop header
LB: loop body
LE: loop exit
PB: predicated region body
PF: predicated region fallthrough
CT: control target
= control target key end

     0   :  { %7 = vsyncpa [#allocation4], 0  ;;  %s265_s0 = inlined_call_operand.hbm [shape: f32[16,32], index: 0, kind: input, shape index: {}]   ;;  %s266_s1 = inlined_call_operand.hbm [shape: f32[32,32], index: 1, kind: input, shape index: {}]   ;;  %s267_s2 = inlined_call_operand.hbm [shape: f32[16,32], index: 2, kind: output, shape index: {}]  }
   0x1   :  { %8 = vsyncpa [#allocation7], 0 }
   0x2   :  { %9 = vsyncpa [#allocation5], 0  ;;  %s218_s9 = smov [#allocation3]  }
   0x3   :  { %s15_s10 = sshll.u32 %s218_s9, 4  ;;  %s16_s10 = int_to_ptr.vmem [resolvable:$true] %s15_s10 }
   0x4   :  { %s160_s11 = scalar_lea.vmem %s16_s10, 256  ;;  %p165_p1 = scmp.lt.s32.totalorder %s16_s10, %s16_s10 }
   0x5   :  { %p161_p0 = scmp.ne.s32.totalorder %s16_s10, %s160_s11  ;;  %p166_p2 = scmp.lt.s32.totalorder %s160_s11, %s160_s11 }
   0x7   :  { %p167_p3 = por %p166_p2, %p165_p1 }
   0x9   :  { %p168_p4 = pnand %p167_p3, %p161_p0 }
   0xb   :  { %171 = shalt.err (!%p168_p4)
}
   0xc   :  { %s219_s12 = smov 128   ;;  %s220_s13 = smov 8  }
   0xd   :  { %21 = dma.hbm_to_vmem [thread:$0]  %s265_s0, 256, %s16_s10, [#allocation4], %s219_s12, %s219_s12, %s220_s13  }
   0xe   :  { %s221_s16 = smov [#allocation6]  }
   0xf   :  { %s27_s17 = sshll.u32 %s221_s16, 4  ;;  %s28_s17 = int_to_ptr.vmem [resolvable:$true] %s27_s17 }
  0x10   :  { %s180_s18 = scalar_lea.vmem %s28_s17, 512  ;;  %p185_p6 = scmp.lt.s32.totalorder %s28_s17, %s28_s17 }
  0x11   :  { %p181_p5 = scmp.ne.s32.totalorder %s28_s17, %s180_s18  ;;  %p186_p7 = scmp.lt.s32.totalorder %s180_s18, %s180_s18 }
  0x13   :  { %p187_p8 = por %p186_p7, %p185_p6 }
  0x15   :  { %p188_p9 = pnand %p187_p8, %p181_p5 }
  0x17   :  { %191 = shalt.err (!%p188_p9)
}
  0x18   :  { %33 = dma.hbm_to_vmem [thread:$0]  %s266_s1, 512, %s28_s17, [#allocation7], %s219_s12, %s219_s12, %s220_s13  }
  0x19   :  { %212 = dma.done.wait [#allocation4], 256  }
  0x1a   :  { %213 = vsyncadd [#allocation4], 4294967040 }
  0x1b   :  { %214 = dma.done.wait [#allocation7], 512  }
  0x1c   :  { %215 = vsyncadd [#allocation7], 4294966784  ;;  %vm45_vm0 = vcmask 261120   ;;  %v222_v0 = vmov 0.0   ;;  %vm223_vm1 = vmmov 0   ;;  %v55_v1 = vld [vmem:[#allocation6 + $0x10] sm:$0xff] }
  0x1d   :  { %137 = vmatprep.subr.bf16.mxu0 %v222_v0  ;;  %141 = vmatprep.mubr.msk.bf16.mxu0 %vm223_vm1, %v222_v0  ;;  %46 = vst.msk [vmem:[#allocation2] sm:$0xff] %vm45_vm0, %v222_v0  ;;  %47 = vst.msk [vmem:[#allocation2 + $0x8] sm:$0xff] %vm45_vm0, %v222_v0  ;;  %v56_v2 = vld [vmem:[#allocation6 + $0x18] sm:$0xff]  ;;  %v53_v3 = vld [vmem:[#allocation6] sm:$0xff]  ;;  %s224_s0 = smov [#allocation8]  }
  0x1e   :  { %v58_v4 = vpack.c.bf16 %v56_v2, %v55_v1  ;;  %v54_v5 = vld [vmem:[#allocation6 + $0x8] sm:$0xff]  ;;  %v50_v7 = vld [vmem:[#allocation3] sm:$0xff]  ;;  %v51_v8 = vld [vmem:[#allocation3 + $0x8] sm:$0xff]  ;;  %s120_s1 = sshll.u32 %s224_s0, 4  ;;  %s121_s1 = int_to_ptr.vmem [resolvable:$true] %s120_s1 }
  0x1f   :  { %v57_v6 = vpack.c.bf16 %v54_v5, %v53_v3  ;;  %v52_v9 = vpack.c.bf16 %v51_v8, %v50_v7  ;;  %s192_s21 = scalar_lea.vmem %s121_s1, 256  ;;  %p197_p11 = scmp.lt.s32.totalorder %s121_s1, %s121_s1 }
  0x20   :  { %138 = vmatpush3.bf16.msra.mxu0 %v58_v4  ;;  %p193_p10 = scmp.ne.s32.totalorder %s121_s1, %s192_s21  ;;  %p198_p12 = scmp.lt.s32.totalorder %s192_s21, %s192_s21 }
  0x21   :  { %139 = vmatprep.subr.bf16.mxu0 %v222_v0 }
  0x22   :  { %p199_p13 = por %p198_p12, %p197_p11 }
  0x24   :  { %140 = vmatpush3.bf16.msra.mxu0 %v57_v6  ;;  %v48_v10 = vld [vmem:[#allocation2] sm:$0xff]  ;;  %v49_v14 = vld [vmem:[#allocation2 + $0x8] sm:$0xff]  ;;  %p200_p0 = pnand %p199_p13, %p193_p10 }
  0x27   :  { %142 = vmatmul.mubr.msk.bf16.vlgmr.msra.gmra.mxu0 %vm45_vm0, %v52_v9 }
  0xe7   :  { %v97_v11 = vpop.f32.mrf.mxu0 }
  0xe8   :  { %v104_v12 = vadd.f32 %v97_v11, %v48_v10 }
  0xe9   :  { %v143_v13 = vpop.f32.mrf.mxu0 }
  0xea   :  { %106 = vst.msk [vmem:[#allocation2] sm:$0xff] %vm45_vm0, %v104_v12 }
  0xeb   :  { %v100_v15 = vpop.f32.mrf.mxu0 }
  0xec   :  { %v105_v16 = vadd.f32 %v100_v15, %v49_v14 }
  0xed   :  { %v144_v17 = vpop.f32.mrf.mxu0 }
  0xee   :  { %107 = vst.msk [vmem:[#allocation2 + $0x8] sm:$0xff] %vm45_vm0, %v105_v16 }
  0xf1   :  { %v111_v18 = vld [vmem:[#allocation2] sm:$0xff] }
  0xf2   :  { %113 = vst.msk [vmem:[#allocation8] sm:$0xff] %vm45_vm0, %v111_v18 }
  0xf5   :  { %v112_v19 = vld [vmem:[#allocation2 + $0x8] sm:$0xff] }
  0xf6   :  { %114 = vst.msk [vmem:[#allocation8 + $0x8] sm:$0xff] %vm45_vm0, %v112_v19 }
  0xf7   :  { %203 = shalt.err (!%p200_p0)
}
  0xf8   :  { %126 = dma.vmem_to_hbm [thread:$0]  %s121_s1, 256, %s267_s2, [#allocation5], %s219_s12, %s219_s12, %s220_s13  }
  0xf9   :  { %216 = dma.done.wait [#allocation5], 256  }
  0xfa   :  { %217 = vsyncadd [#allocation5], 4294967040 }
  0xfb   :  { %130 = vsyncpa [#allocation4], 1 }
  0xfc   :  { %131 = vsyncpa [#allocation7], 1 }
  0xfd   :  { %132 = vsyncpa [#allocation5], 1 }

</bundles_post_ra>
